<compile_context>
chip_gen: v5e
topology: v5e:2x2
jax: 0.10.0
libtpu: 0.0.40
codegen_flags: <defaults>
</compile_context>

<pallas_src>
import jax
import jax.numpy as jnp
from jax.experimental import pallas as pl
from jax.experimental.pallas import tpu as pltpu

_LANE = 128
_SUBLANE = 8
_MAX_TM = 8192          # hard cap on the row-tile height


def _round_up(x, n):
    return ((x + n - 1) // n) * n


def _vmem_limits():
    """Returns (compiler vmem limit, TM-search budget), generation aware."""
    try:
        cap = getattr(pltpu.get_tpu_info(), "vmem_capacity_bytes", None)
    except Exception:
        cap = None
    if not cap:
        cap = 64 * 1024 * 1024            # conservative: v7x physical VMEM / TC
    limit = int(cap) * 3 // 4             # ~96 MiB on v5e/v6e, ~48 MiB on v7x
    budget = limit - (2 << 20)            # headroom for compiler internal scratch
    return limit, budget


def _choose_tm(m, f_in, f_out_b, x_bytes, w_bytes, b_bytes, o_bytes, budget):
    """Pick the row-tile height TM for the flattened M = prod(leading dims)."""
    # dtype-aware sublane floor: 8 rows f32, 16 bf16, 32 int8/fp8.
    floor = max(_SUBLANE, 32 // x_bytes)
    # Pallas allocates 2 buffers per input even when the index_map is constant,
    # so count the resident weight/bias twice.
    resident = 2 * (f_in * f_out_b * w_bytes + f_out_b * b_bytes)
    per_row = 2 * (f_in * x_bytes + f_out_b * o_bytes)  # dbl-buffered x + out
    avail = budget - resident
    if avail < per_row * floor:
        # TODO(synk): add K/N grid axes + f32 accumulator scratch (pl.when
        # init/finalize) for weights too large to stay VMEM-resident.
        raise ValueError(
            "TimeDistributed linear: weight does not fit VMEM-resident with a "
            "minimal row tile; K/N tiling fallback not implemented.")
    tm_budget = avail // per_row
    # Keep >= 8 row tiles when there is enough work so the "parallel" grid
    # axis can actually split across v7x's two TensorCores (free on v5e/v6e).
    if m >= 8 * floor:
        tm_parallel = pl.cdiv(m, 8)
    elif m >= 2 * floor:
        tm_parallel = pl.cdiv(m, 2)
    else:
        tm_parallel = m
    tm = min(tm_budget, tm_parallel, _MAX_TM)
    if tm >= m:
        return m          # single tile; block dim == full array dim is legal
    # Round down to an MXU-friendly granularity (256 keeps the MXU M dim full
    # on v6e/v7x) but never below the dtype sublane floor.
    gran = 256 if tm >= 256 else floor
    return max(floor, (tm // gran) * gran)


def _td_linear_kernel(x_ref, w_ref, b_ref, o_ref):
    # x_ref: (TM, K)   streamed row tile of the flattened input
    # w_ref: (K, Nb)   VMEM-resident weight (same block every grid step)
    # b_ref: (1, Nb)   VMEM-resident bias row
    # o_ref: (TM, Nb)  output row tile
    acc = jnp.dot(x_ref[...], w_ref[...], preferred_element_type=jnp.float32)
    acc = acc + b_ref[...].astype(jnp.float32)   # f32 bias epilogue, row broadcast
    o_ref[...] = acc.astype(o_ref.dtype)


def time_distributed_linear(input_seq, weight, bias, *, batch_first=True):
    """Equivalent of TimeDistributed(nn.Linear)(input_seq).

    input_seq: (B, T, F_in)  (any rank > 2; leading axes are flattened)
    weight:    (F_in, F_out)  (transpose of nn.Linear's weight, so x @ W)
    bias:      (F_out,)
    """
    assert input_seq.ndim > 2
    f_in = input_seq.shape[-1]
    f_out = weight.shape[-1]
    assert weight.shape[0] == f_in
    assert bias.shape == (f_out,)
    out_dtype = input_seq.dtype

    # Flatten all leading axes: (-1, F_in)  -- plain-JAX glue.
    x2d = input_seq.reshape(-1, f_in)
    m = x2d.shape[0]

    # Lane-pad F_out only when the write amplification is negligible (wide,
    # nearly lane-aligned outputs).  Narrow outputs keep native width: masked
    # stores are far cheaper than padded HBM writes + a post-kernel slice.
    f_out_aligned = _round_up(f_out, _LANE)
    pad_n = (f_out_aligned != f_out and f_out >= _LANE
             and f_out_aligned * 8 <= f_out * 9)          # <= 12.5% waste
    if pad_n:
        weight_k = jnp.pad(weight, ((0, 0), (0, f_out_aligned - f_out)))
        bias_k = jnp.pad(bias, ((0, f_out_aligned - f_out),))
        f_out_b = f_out_aligned
    else:
        weight_k, bias_k, f_out_b = weight, bias, f_out
    bias2d = bias_k.reshape(1, f_out_b)

    x_bytes = jnp.dtype(x2d.dtype).itemsize
    w_bytes = jnp.dtype(weight_k.dtype).itemsize
    b_bytes = jnp.dtype(bias2d.dtype).itemsize
    o_bytes = jnp.dtype(out_dtype).itemsize

    vmem_limit, vmem_budget = _vmem_limits()
    tm = _choose_tm(m, f_in, f_out_b, x_bytes, w_bytes, b_bytes, o_bytes,
                    vmem_budget)
    # Ragged last block is masked by Pallas -> no jnp.pad of x / extra HBM pass.
    grid_m = pl.cdiv(m, tm)

    cost = pl.CostEstimate(
        flops=2 * m * f_in * f_out_b,
        transcendentals=0,
        bytes_accessed=(m * f_in * x_bytes
                        + f_in * f_out_b * w_bytes
                        + f_out_b * b_bytes
                        + m * f_out_b * o_bytes),
    )

    # TODO(synk): if an xprof trace on v5e shows exposed DMA, bump the streamed
    # x/out BlockSpecs to pipeline_mode=pl.Buffered(3); VMEM is cheap here.
    out2d = pl.pallas_call(
        _td_linear_kernel,
        out_shape=jax.ShapeDtypeStruct((m, f_out_b), out_dtype),
        grid_spec=pltpu.PrefetchScalarGridSpec(
            num_scalar_prefetch=0,
            grid=(grid_m,),
            in_specs=[
                pl.BlockSpec((tm, f_in), lambda i: (i, 0)),        # streamed rows
                pl.BlockSpec((f_in, f_out_b), lambda i: (0, 0)),   # resident weight
                pl.BlockSpec((1, f_out_b), lambda i: (0, 0)),      # resident bias
            ],
            out_specs=pl.BlockSpec((tm, f_out_b), lambda i: (i, 0)),
        ),
        compiler_params=pltpu.CompilerParams(
            dimension_semantics=("parallel",),   # shard row tiles on v7x's 2 TCs
            vmem_limit_bytes=vmem_limit,
        ),
        cost_estimate=cost,
    )(x2d, weight_k, bias2d)

    if pad_n:
        out2d = out2d[:, :f_out]

    if batch_first:
        return out2d.reshape(input_seq.shape[0], -1, f_out)
    # Standard TimeDistributed grouping by the sequence axis (dim 1); the
    # reference snippet's `input_seq.size(-1)` here is the well-known typo.
    return out2d.reshape(-1, input_seq.shape[1], f_out)


if __name__ == "__main__":
    key = jax.random.PRNGKey(0)
    k_x, k_w, k_b = jax.random.split(key, 3)

    # 1) Small shapes consistent with the module's typical LAS usage.
    B, T, F_IN, F_OUT = 2, 8, 32, 32
    x = jax.random.normal(k_x, (B, T, F_IN), dtype=jnp.float32)
    weight = jax.random.normal(k_w, (F_IN, F_OUT), dtype=jnp.float32) * 0.1
    bias = jax.random.normal(k_b, (F_OUT,), dtype=jnp.float32) * 0.1

    out = jax.block_until_ready(
        time_distributed_linear(x, weight, bias, batch_first=True))
    ref = (x.reshape(-1, F_IN) @ weight + bias).reshape(B, -1, F_OUT)
    assert out.shape == (B, T, F_OUT)
    assert jnp.allclose(out, ref, atol=1e-5, rtol=1e-5)

    # 2) Ragged shapes: exercises the masked ragged last row-block and the
    #    "no lane padding" narrow-output path (F_OUT = 40).
    k_x2, k_w2, k_b2 = jax.random.split(jax.random.PRNGKey(1), 3)
    B2, T2, F_IN2, F_OUT2 = 3, 37, 48, 40
    x2 = jax.random.normal(k_x2, (B2, T2, F_IN2), dtype=jnp.float32)
    w2 = jax.random.normal(k_w2, (F_IN2, F_OUT2), dtype=jnp.float32) * 0.1
    b2 = jax.random.normal(k_b2, (F_OUT2,), dtype=jnp.float32) * 0.1
    out2 = jax.block_until_ready(
        time_distributed_linear(x2, w2, b2, batch_first=True))
    ref2 = (x2.reshape(-1, F_IN2) @ w2 + b2).reshape(B2, -1, F_OUT2)
    assert out2.shape == (B2, T2, F_OUT2)
    assert jnp.allclose(out2, ref2, atol=1e-5, rtol=1e-5)

    out2b = jax.block_until_ready(
        time_distributed_linear(x2, w2, b2, batch_first=False))
    assert out2b.shape == (B2, T2, F_OUT2)
    assert jnp.allclose(out2b, ref2, atol=1e-5, rtol=1e-5)

    # 3) Lane-aligned wider output with multiple grid steps (pipelined path).
    k_x3, k_w3, k_b3 = jax.random.split(jax.random.PRNGKey(2), 3)
    B3, T3, F_IN3, F_OUT3 = 4, 64, 64, 128
    x3 = jax.random.normal(k_x3, (B3, T3, F_IN3), dtype=jnp.float32)
    w3 = jax.random.normal(k_w3, (F_IN3, F_OUT3), dtype=jnp.float32) * 0.1
    b3 = jax.random.normal(k_b3, (F_OUT3,), dtype=jnp.float32) * 0.1
    out3 = jax.block_until_ready(
        time_distributed_linear(x3, w3, b3, batch_first=True))
    ref3 = (x3.reshape(-1, F_IN3) @ w3 + b3).reshape(B3, -1, F_OUT3)
    assert out3.shape == (B3, T3, F_OUT3)
    assert jnp.allclose(out3, ref3, atol=1e-4, rtol=1e-4)

    print("KERNEL_OK")
</pallas_src>

<mosaic_0001>
module attributes {stable_mosaic.version = 11 : i64} {
  func.func @_td_linear_kernel(%arg0: i32, %arg1: memref<8x32xf32, #tpu.memory_space<vmem>>, %arg2: memref<32x32xf32, #tpu.memory_space<vmem>>, %arg3: memref<1x32xf32, #tpu.memory_space<vmem>>, %arg4: memref<8x32xf32, #tpu.memory_space<vmem>>) attributes {dimension_semantics = [#tpu.dimension_semantics<parallel>], iteration_bounds = array<i64: 2>, scalar_prefetch = 0 : i64, scratch_operands = 0 : i64, tpu.core_type = #tpu.core_type<tc>, window_params = [{transform_indices = @transform_0, window_bounds = array<i64: 8, 32>}, {pipeline_mode = #tpu.pipeline_mode<synchronous>, transform_indices = @transform_1, window_bounds = array<i64: 32, 32>}, {pipeline_mode = #tpu.pipeline_mode<synchronous>, transform_indices = @transform_2, window_bounds = array<i64: 1, 32>}, {transform_indices = @transform_3, window_bounds = array<i64: 8, 32>}]} {
    %c0 = arith.constant 0 : index
    %c0_0 = arith.constant 0 : index
    %0 = vector.load %arg1[%c0, %c0_0] : memref<8x32xf32, #tpu.memory_space<vmem>>, vector<8x32xf32>
    %c0_1 = arith.constant 0 : index
    %c0_2 = arith.constant 0 : index
    %1 = vector.load %arg2[%c0_1, %c0_2] : memref<32x32xf32, #tpu.memory_space<vmem>>, vector<32x32xf32>
    %cst = arith.constant dense<0.000000e+00> : vector<8x32xf32>
    %2 = tpu.matmul %0, %1, %cst {dimension_numbers = #tpu.dot_dimension_numbers<[1], [0], [0], [1], [0, 0, 1, 1], [], []>} : vector<8x32xf32>, vector<32x32xf32>, vector<8x32xf32> -> vector<8x32xf32>
    %c0_3 = arith.constant 0 : index
    %c0_4 = arith.constant 0 : index
    %3 = vector.load %arg3[%c0_3, %c0_4] : memref<1x32xf32, #tpu.memory_space<vmem>>, vector<1x32xf32>
    %4 = vector.broadcast %3 : vector<1x32xf32> to vector<8x32xf32>
    %5 = arith.addf %2, %4 : vector<8x32xf32>
    %c0_5 = arith.constant 0 : index
    %c0_6 = arith.constant 0 : index
    %6 = vector.load %arg4[%c0_5, %c0_6] : memref<8x32xf32, #tpu.memory_space<vmem>>, vector<8x32xf32>
    tpu.vector_store %arg4[%c0_5, %c0_6], %5 {strides = array<i32>} : memref<8x32xf32, #tpu.memory_space<vmem>>, vector<8x32xf32>,
    return
  }
  func.func @transform_0(%arg0: i32) -> (i32, i32) {
    %c0_i32 = arith.constant 0 : i32
    %c0_i32_0 = arith.constant 0 : i32
    return %arg0, %c0_i32 : i32, i32
  }
  func.func @transform_1(%arg0: i32) -> (i32, i32) {
    %c0_i32 = arith.constant 0 : i32
    %c0_i32_0 = arith.constant 0 : i32
    %c0_i32_1 = arith.constant 0 : i32
    return %c0_i32, %c0_i32_0 : i32, i32
  }
  func.func @transform_2(%arg0: i32) -> (i32, i32) {
    %c0_i32 = arith.constant 0 : i32
    %c0_i32_0 = arith.constant 0 : i32
    %c0_i32_1 = arith.constant 0 : i32
    return %c0_i32, %c0_i32_0 : i32, i32
  }
  func.func @transform_3(%arg0: i32) -> (i32, i32) {
    %c0_i32 = arith.constant 0 : i32
    %c0_i32_0 = arith.constant 0 : i32
    return %arg0, %c0_i32 : i32, i32
  }
}

</mosaic_0001>

<bundles_post_ra>
// kernel: tpu_custom_call.1
= control target key start
LH: loop header
LB: loop body
LE: loop exit
PB: predicated region body
PF: predicated region fallthrough
CT: control target
= control target key end

     0   :  { %8 = vsyncpa [#allocation3], 0  ;;  %s704_s0 = inlined_call_operand.hbm [shape: f32[16,32], index: 0, kind: input, shape index: {}]   ;;  %s705_s1 = inlined_call_operand.hbm [shape: f32[32,32], index: 1, kind: input, shape index: {}]   ;;  %s706_s2 = inlined_call_operand.vmem [shape: f32[1,32], index: 2, kind: input, shape index: {}]   ;;  %s707_s3 = inlined_call_operand.hbm [shape: f32[16,32], index: 3, kind: output, shape index: {}]  }
   0x1   :  { %10 = vsyncpa [#allocation3 + $0x1], 0 }
   0x2   :  { %11 = vsyncpa [#allocation6], 0 }
   0x3   :  { %12 = vsyncpa [#allocation4], 0 }
   0x4   :  { %14 = vsyncpa [#allocation4 + $0x1], 0  ;;  %s565_s12 = smov 0   ;;  %s567_s13 = smov 0  }
   0x5   :  { %s569_s14 = smov 0   ;;  %s571_s15 = smov 0  }
   0x6 LB: > { %s130_s18 = sshll.u32 %s705_s1, 4  ;;  %s589_s19 = sadd.s32 4294967295, %s540_s15   ;;  %s540_s15 = sphi %s571_s15, %s717_s15   ;;  %s536_s14 = sphi %s569_s14, %s716_s14   ;;  %s532_s13 = sphi %s567_s13, %s715_s13   ;;  %s528_s12 = sphi %s565_s12, %s714_s12   ;;  %s131_s18 = int_to_ptr.hbm [resolvable:$true] %s130_s18 }
   0x7   : > { %p336_p0 = scmp.ge.s32.totalorder %s540_s15, 1  ;;  %p41_p1 = scmp.eq.s32.totalorder %s589_s19, 0 }
   0x8   : > { %p119_p2 = scmp.lt.s32.totalorder %s540_s15, 3  ;;  %s542_s21 = smov [#allocation5]  }
   0x9   : > { %s132_s22 = sshll.u32 %s542_s21, 4  ;;  %s543_s23 = smov 128   ;;  %s133_s22 = int_to_ptr.vmem [resolvable:$true] %s132_s22 }
   0xa   : > { %p594_p3 = pnand %p336_p0, %p119_p2  ;;  %s544_s24 = smov 8  }
   0xb   : > { %s335_s25 = sadd.s32 4294967294, %s540_s15   ;;  %s605_s26 = sadd.s32 1, %s540_s15  }
   0xc   : > { %p358_p4 = pneg %p594_p3  ;;  %s27_s27 = sadd.s32 1, %s536_s14 }
   0xd   : > { %s24_s28 = ssub.s32 %s540_s15, %s605_s26  ;;  %p34_p7 = scmp.ne.s32.totalorder %s536_s14, %s532_s13 }
   0xe   : > { %p359_p6 = pnand %p358_p4, %p41_p1  ;;  %p25_p8 = scmp.eq.s32.totalorder %s24_s28, 0 }
   0xf   : > { %p35_p9 = scmp.eq.s32.totalorder %s540_s15, 0  ;;  %p40_p10 = scmp.ne.s32.totalorder %s532_s13, %s528_s12 }
  0x10   : > { %361 = dma.hbm_to_vmem [thread:$0]  (!%p359_p6), %s131_s18, 512, %s133_s22, [#allocation6], %s543_s23, %s543_s23, %s544_s24  }
  0x11   : > { %p106_p11 = scmp.eq.s32.totalorder %s589_s19, 1  ;;  %p621_p12 = por %p41_p1, %p40_p10 }
  0x12   : > { %s617_s29 = scalar_select %p25_p8, %s536_s14, %s27_s27  }
  0x13   : > { %p625_p13 = por %p106_p11, %p34_p7  ;;  %p112_p0 = scmp.eq.s32.totalorder %s335_s25, 1 }
  0x14   : > { %p36_p2 = por %p35_p9, %p34_p7  ;;  %s149_s5 = sand.u32 1, %s536_s14  }
  0x15   : > { %p630_p4 = por %p112_p0, %p40_p10  ;;  %p371_p6 = scmp.lt.s32.totalorder %s540_s15, 2 }
  0x16   : > { %s339_s7 = sshll.u32 %s149_s5, 3  ;;  %s340_s8 = sshll.u32 %s540_s15, 3 }
  0x17   : > { %s157_s11 = scalar_lea.hbm %s704_s0, %s340_s8  ;;  %s153_s17 = scalar_lea.vmem [#allocation2], %s339_s7 }
  0x18   : > { %s159_s16 = sshll.u32 %s157_s11, 4  ;;  %s161_s18 = sshll.u32 %s153_s17, 4  ;;  %s160_s16 = int_to_ptr.hbm [resolvable:$true] %s159_s16  ;;  %s162_s18 = int_to_ptr.vmem [resolvable:$true] %s161_s18 }
  0x19   : > { %p639_p8 = pnand %p371_p6, %p36_p2  ;;  %s150_s22 = scalar_lea.sflag [#allocation3], %s149_s5 }
  0x1a   : > { %s440_s23 = sshra.s32 %s160_s16, 4  ;;  %s447_s28 = scalar_lea.hbm %s704_s0, 16  ;;  %s441_s23 = int_to_ptr.hbm [resolvable:$true] %s440_s23 }
  0x1b   : > { %s442_s24 = scalar_lea.hbm %s441_s23, 8  ;;  %p444_p9 = pneg %p639_p8 }
  0x1c   : > { %p443_p7 = scmp.ne.s32.totalorder %s441_s23, %s442_s24  ;;  %p448_p0 = scmp.lt.s32.totalorder %s441_s23, %s704_s0 }
  0x1d   : > { %p449_p2 = scmp.lt.s32.totalorder %s447_s28, %s442_s24 }
  0x1e   : > { %p445_p10 = pnand %p444_p9, %p443_p7 }
  0x1f   : > { %p450_p6 = por %p449_p2, %p448_p0 }
  0x20   : > { %p446_p11 = pneg %p445_p10 }
  0x22   : > { %p451_p5 = pnand %p450_p6, %p446_p11 }
  0x24   : > { %454 = shalt.err (!%p451_p5)
}
  0x25   : > { %365 = dma.hbm_to_vmem [thread:$0]  (!%p639_p8), %s160_s16, 128, %s162_s18, %s150_s22  }
  0x26   : > { %170 = sbr.rel (%p594_p3) target bundleno = 185 (0xb9), region = 32  ;;  %s656_s5 = sand.u32 (!%p594_p3), 1, %s532_s13  }
  0x27   : > { %s342_s9 = sshll.u32 (!%p594_p3), %s656_s5, 3  ;;  %s173_s10 = scalar_lea.sflag (!%p594_p3), [#allocation3], %s656_s5 }
  0x28   : > { %s176_s11 = scalar_lea.vmem (!%p594_p3), [#allocation2], %s342_s9 }
  0x2b   : > { %515 = dma.done.wait (%p621_p12), %s173_s10, 128  }
  0x2c   : > { %517 = vsyncadd (%p621_p12), %s173_s10, 4294967168 }
  0x2d   : > { %519 = dma.done.wait (%p41_p1), [#allocation6], 512  }
  0x2e   : > { %521 = vsyncadd (%p41_p1), [#allocation6], 4294966784  ;;  %v209_v0 = vld [vmem:[#allocation5 + $0x18] sm:$0xff]  ;;  %v208_v1 = vld [vmem:[#allocation5 + $0x10] sm:$0xff]  ;;  %vm214_vm0 = vcmask 261120   ;;  %s347_s20 = sshll.u32 %s589_s19, 3 }
  0x2f   : > { %230 = vmatpush.msra.mxu0 %v209_v0  ;;  %v207_v2 = vld [vmem:[#allocation5 + $0x8] sm:$0xff]  ;;  %v206_v3 = vld [vmem:[#allocation5] sm:$0xff]  ;;  %v205_v4 = vld [vmem:[%s176_s11] sm:$0xff]  ;;  %s250_s17 = scalar_lea.hbm %s707_s3, %s347_s20  ;;  %s204_s22 = scalar_lea.vmem [#allocation7], %s342_s9 }
  0x30   : > { %v409_v5 = vld [vmem:[%s706_s2] ss:$0 sm:$0xff]  ;;  %s252_s23 = sshll.u32 %s204_s22, 4  ;;  %s254_s24 = sshll.u32 %s250_s17, 4  ;;  %s253_s23 = int_to_ptr.vmem [resolvable:$true] %s252_s23  ;;  %s255_s24 = int_to_ptr.hbm [resolvable:$true] %s254_s24 }
  0x31   : > { %231 = vmatpush.msra.mxu0 %v208_v1  ;;  %s240_s25 = scalar_lea.sflag [#allocation4], %s656_s5  ;;  %s484_s27 = sshra.s32 %s255_s24, 4  ;;  %s485_s27 = int_to_ptr.hbm [resolvable:$true] %s484_s27 }
  0x32   : > { %s486_s19 = scalar_lea.hbm %s485_s27, 8  ;;  %s490_s8 = scalar_lea.hbm %s707_s3, 16 }
  0x33   : > { %232 = vmatpush.msra.mxu0 %v207_v2  ;;  %p487_p1 = scmp.ne.s32.totalorder %s485_s27, %s486_s19  ;;  %p491_p12 = scmp.lt.s32.totalorder %s485_s27, %s707_s3 }
  0x34   : > { %p492_p8 = scmp.lt.s32.totalorder %s490_s8, %s486_s19 }
  0x35   : > { %233 = vmatpush.msra.mxu0 %v206_v3  ;;  %p488_p3 = pnand %p487_p1, %p625_p13 }
  0x36   : > { %345 = vmatmul.msk.f32.vlgmr.msra.gmra.mxu0 %vm214_vm0, %v205_v4  ;;  %p493_p7 = por %p492_p8, %p491_p12 }
  0x37   : > { %p489_p5 = pneg %p488_p3 }
  0x39   : > { %p494_p9 = pnand %p493_p7, %p489_p5 }
  0xb3   : > { %v235_v6 = vpop.f32.mrf.mxu0 }
  0xb4   : > { %v236_v7 = vadd.f32 %v409_v5, %v235_v6 }
  0xb6   : > { %238 = vst.msk [vmem:[%s204_s22] sm:$0xff] %vm214_vm0, %v236_v7 }
  0xb7   : > { %497 = shalt.err (!%p494_p9)
}
  0xb8   : > { %356 = dma.vmem_to_hbm [thread:$0]  (%p625_p13), %s253_s23, 128, %s255_s24, %s240_s25  }
  0xb9 PF: > { %s266_s5 = sand.u32 1, %s528_s12   ;;  %p713_p10 = scmp.ge.s32.totalorder %s540_s15, 2 }
  0xba   : > { %s267_s11 = scalar_lea.sflag [#allocation4], %s266_s5 }
  0xbb   : > { %p367_p11 = pnand %p713_p10, %p630_p4 }
  0xbd   : > { %p368_p0 = pneg %p367_p11 }
  0xbf   : > { %523 = dma.done.wait (%p368_p0), %s267_s11, 128  }
  0xc0   : > { %525 = vsyncadd (%p368_p0), %s267_s11, 4294967168  ;;  %p17_p2 = scmp.ge.s32.totalorder %s605_s26, 4   ;;  %s714_s12 = smov %s532_s13 }
  0xc1   : > { %s715_s13 = smov %s536_s14  ;;  %s716_s14 = smov %s617_s29 }
  0xc2   : > { %s717_s15 = smov %s605_s26  ;;  %19 = sbr.rel (!%p17_p2) target bundleno = 6 (0x6), region = 81 }
  0xc7   :  { %273 = vsyncpa [#allocation3], 1 }
  0xc8   :  { %275 = vsyncpa [#allocation3 + $0x1], 1 }
  0xc9   :  { %276 = vsyncpa [#allocation6], 1 }
  0xca   :  { %277 = vsyncpa [#allocation4], 1 }
  0xcb   :  { %279 = vsyncpa [#allocation4 + $0x1], 1 }

</bundles_post_ra>
